<compile_context>
chip_gen: v6e
topology: v6e:2x2x1
jax: 0.10.0
libtpu: 0.0.40
codegen_flags: <defaults>
</compile_context>

<pallas_src>
import functools

import jax
import jax.numpy as jnp
from jax import lax
from jax.experimental import pallas as pl
from jax.experimental.pallas import tpu as pltpu

LN_EPS = 1e-5


def _seqnn_kernel(x_ref, w_ref, b_ref, o_ref, *, num_steps, inv_dim):
    # Whole problem is VMEM-resident: x [B, dim], w [num_steps, dim, dim],
    # b [num_steps, 1, dim].  Hidden state is carried as a loop value (registers),
    # not scratch.
    h0 = x_ref[...].astype(jnp.float32)

    def step(i, h):
        w = w_ref[i]                                  # [dim, dim]
        b = b_ref[i]                                  # [1, dim]

        # Linear: h @ W + b  (W already transposed vs. torch's [out, in] layout)
        y = jnp.dot(h, w, preferred_element_type=jnp.float32) + b

        # LayerNorm (no affine, biased variance) via two independent reductions:
        #   mean = sum(y)/dim ; var = sum(y*y)/dim - mean^2
        s = jnp.sum(y, axis=-1, keepdims=True)
        ss = jnp.sum(y * y, axis=-1, keepdims=True)
        mean = s * inv_dim
        var = jnp.maximum(ss * inv_dim - mean * mean, 0.0)
        y_norm = (y - mean) * lax.rsqrt(var + LN_EPS)

        # ReLU
        return jnp.maximum(y_norm, 0.0)

    h = lax.fori_loop(0, num_steps, step, h0, unroll=True)
    o_ref[...] = h.astype(o_ref.dtype)


def seqnn_forward(x, weights_t, biases):
    """x: [B, dim]; weights_t: [num_steps, dim, dim] (x @ W layout); biases: [num_steps, dim]."""
    B, dim = x.shape
    num_steps = weights_t.shape[0]

    if num_steps == 0:
        # nn.Sequential of zero modules is the identity.
        return x

    biases2d = biases.reshape(num_steps, 1, dim)  # keep per-step bias 2D (TPU-friendly)

    kernel = functools.partial(
        _seqnn_kernel, num_steps=num_steps, inv_dim=1.0 / float(dim))

    return pl.pallas_call(
        kernel,
        out_shape=jax.ShapeDtypeStruct((B, dim), x.dtype),
        in_specs=[
            pl.BlockSpec(memory_space=pltpu.MemorySpace.VMEM),  # x
            pl.BlockSpec(memory_space=pltpu.MemorySpace.VMEM),  # all step weights
            pl.BlockSpec(memory_space=pltpu.MemorySpace.VMEM),  # all step biases
        ],
        out_specs=pl.BlockSpec(memory_space=pltpu.MemorySpace.VMEM),
    )(x, weights_t, biases2d)


def seqnn_reference(x, weights_t, biases):
    """Pure-JAX reference of the same forward pass (torch LayerNorm semantics)."""
    h = x.astype(jnp.float32)
    for i in range(weights_t.shape[0]):
        y = h @ weights_t[i] + biases[i][None, :]
        mean = jnp.mean(y, axis=-1, keepdims=True)
        var = jnp.mean((y - mean) ** 2, axis=-1, keepdims=True)
        y = (y - mean) / jnp.sqrt(var + LN_EPS)
        h = jnp.maximum(y, 0.0)
    return h.astype(x.dtype)


if __name__ == "__main__":
    key = jax.random.PRNGKey(0)

    num_steps = 4      # SeqNN(num_steps, dim)
    dim = 128          # lane-dense feature dim (full 128-lane occupancy)
    batch = 8

    k_x, k_w, k_b = jax.random.split(key, 3)

    # Deterministic parameter init mimicking torch.nn.Linear default:
    # U(-1/sqrt(fan_in), 1/sqrt(fan_in)) for both weight and bias.
    bound = 1.0 / jnp.sqrt(jnp.float32(dim))
    # torch weight is [out, in]; store transposed [num_steps, in, out] for h @ W.
    weights_t = jax.random.uniform(
        k_w, (num_steps, dim, dim), jnp.float32, minval=-bound, maxval=bound)
    biases = jax.random.uniform(
        k_b, (num_steps, dim), jnp.float32, minval=-bound, maxval=bound)

    x = jax.random.normal(k_x, (batch, dim), jnp.float32)

    out = seqnn_forward(x, weights_t, biases)
    out = jax.block_until_ready(out)

    ref = seqnn_reference(x, weights_t, biases)
    assert out.shape == (batch, dim)
    assert jnp.allclose(out, ref, atol=1e-4, rtol=1e-4), "mismatch vs reference"

    print("KERNEL_OK")
</pallas_src>

<mosaic_0001>
module attributes {stable_mosaic.version = 11 : i64} {
  func.func @_seqnn_kernel(%arg0: memref<8x128xf32, #tpu.memory_space<vmem>>, %arg1: memref<4x128x128xf32, #tpu.memory_space<vmem>>, %arg2: memref<4x1x128xf32, #tpu.memory_space<vmem>>, %arg3: memref<8x128xf32, #tpu.memory_space<vmem>>) attributes {dimension_semantics = [], scalar_prefetch = 0 : i64, scratch_operands = 0 : i64, tpu.core_type = #tpu.core_type<tc>} {
    %c0 = arith.constant 0 : index
    %c0_0 = arith.constant 0 : index
    %0 = vector.load %arg0[%c0, %c0_0] : memref<8x128xf32, #tpu.memory_space<vmem>>, vector<8x128xf32>
    %c0_i32 = arith.constant 0 : i32
    %1 = arith.index_cast %c0_i32 : i32 to index
    %c0_1 = arith.constant 0 : index
    %c0_2 = arith.constant 0 : index
    %2 = vector.load %arg1[%1, %c0_1, %c0_2] : memref<4x128x128xf32, #tpu.memory_space<vmem>>, vector<1x128x128xf32>
    %3 = vector.shape_cast %2 : vector<1x128x128xf32> to vector<128x128xf32>
    %4 = arith.index_cast %c0_i32 : i32 to index
    %c0_3 = arith.constant 0 : index
    %c0_4 = arith.constant 0 : index
    %5 = vector.load %arg2[%4, %c0_3, %c0_4] : memref<4x1x128xf32, #tpu.memory_space<vmem>>, vector<1x1x128xf32>
    %6 = vector.shape_cast %5 : vector<1x1x128xf32> to vector<1x128xf32>
    %cst = arith.constant dense<0.000000e+00> : vector<8x128xf32>
    %7 = tpu.matmul %0, %3, %cst {dimension_numbers = #tpu.dot_dimension_numbers<[1], [0], [0], [1], [0, 0, 1, 1], [], []>} : vector<8x128xf32>, vector<128x128xf32>, vector<8x128xf32> -> vector<8x128xf32>
    %8 = vector.broadcast %6 : vector<1x128xf32> to vector<8x128xf32>
    %9 = arith.addf %7, %8 : vector<8x128xf32>
    %cst_5 = arith.constant dense<0.000000e+00> : vector<8xf32>
    %10 = vector.multi_reduction <add>, %9, %cst_5 [1] : vector<8x128xf32> to vector<8xf32>
    %11 = vector.shape_cast %10 : vector<8xf32> to vector<8x1xf32>
    %12 = arith.mulf %9, %9 : vector<8x128xf32>
    %cst_6 = arith.constant dense<0.000000e+00> : vector<8xf32>
    %13 = vector.multi_reduction <add>, %12, %cst_6 [1] : vector<8x128xf32> to vector<8xf32>
    %14 = vector.shape_cast %13 : vector<8xf32> to vector<8x1xf32>
    %cst_7 = arith.constant 7.812500e-03 : f32
    %15 = vector.broadcast %cst_7 : f32 to vector<8x1xf32>
    %16 = arith.mulf %11, %15 : vector<8x1xf32>
    %cst_8 = arith.constant 7.812500e-03 : f32
    %17 = vector.broadcast %cst_8 : f32 to vector<8x1xf32>
    %18 = arith.mulf %14, %17 : vector<8x1xf32>
    %19 = arith.mulf %16, %16 : vector<8x1xf32>
    %20 = arith.subf %18, %19 : vector<8x1xf32>
    %cst_9 = arith.constant 0.000000e+00 : f32
    %21 = vector.broadcast %cst_9 : f32 to vector<8x1xf32>
    %22 = arith.maximumf %20, %21 : vector<8x1xf32>
    %23 = vector.broadcast %16 : vector<8x1xf32> to vector<8x128xf32>
    %24 = arith.subf %9, %23 : vector<8x128xf32>
    %cst_10 = arith.constant 9.99999974E-6 : f32
    %25 = vector.broadcast %cst_10 : f32 to vector<8x1xf32>
    %26 = arith.addf %22, %25 : vector<8x1xf32>
    %27 = math.rsqrt %26 : vector<8x1xf32>
    %28 = vector.broadcast %27 : vector<8x1xf32> to vector<8x128xf32>
    %29 = arith.mulf %24, %28 : vector<8x128xf32>
    %cst_11 = arith.constant 0.000000e+00 : f32
    %30 = vector.broadcast %cst_11 : f32 to vector<8x128xf32>
    %31 = arith.maximumf %29, %30 : vector<8x128xf32>
    %c1_i32 = arith.constant 1 : i32
    %32 = arith.index_cast %c1_i32 : i32 to index
    %c0_12 = arith.constant 0 : index
    %c0_13 = arith.constant 0 : index
    %33 = vector.load %arg1[%32, %c0_12, %c0_13] : memref<4x128x128xf32, #tpu.memory_space<vmem>>, vector<1x128x128xf32>
    %34 = vector.shape_cast %33 : vector<1x128x128xf32> to vector<128x128xf32>
    %35 = arith.index_cast %c1_i32 : i32 to index
    %c0_14 = arith.constant 0 : index
    %c0_15 = arith.constant 0 : index
    %36 = vector.load %arg2[%35, %c0_14, %c0_15] : memref<4x1x128xf32, #tpu.memory_space<vmem>>, vector<1x1x128xf32>
    %37 = vector.shape_cast %36 : vector<1x1x128xf32> to vector<1x128xf32>
    %cst_16 = arith.constant dense<0.000000e+00> : vector<8x128xf32>
    %38 = tpu.matmul %31, %34, %cst_16 {dimension_numbers = #tpu.dot_dimension_numbers<[1], [0], [0], [1], [0, 0, 1, 1], [], []>} : vector<8x128xf32>, vector<128x128xf32>, vector<8x128xf32> -> vector<8x128xf32>
    %39 = vector.broadcast %37 : vector<1x128xf32> to vector<8x128xf32>
    %40 = arith.addf %38, %39 : vector<8x128xf32>
    %cst_17 = arith.constant dense<0.000000e+00> : vector<8xf32>
    %41 = vector.multi_reduction <add>, %40, %cst_17 [1] : vector<8x128xf32> to vector<8xf32>
    %42 = vector.shape_cast %41 : vector<8xf32> to vector<8x1xf32>
    %43 = arith.mulf %40, %40 : vector<8x128xf32>
    %cst_18 = arith.constant dense<0.000000e+00> : vector<8xf32>
    %44 = vector.multi_reduction <add>, %43, %cst_18 [1] : vector<8x128xf32> to vector<8xf32>
    %45 = vector.shape_cast %44 : vector<8xf32> to vector<8x1xf32>
    %cst_19 = arith.constant 7.812500e-03 : f32
    %46 = vector.broadcast %cst_19 : f32 to vector<8x1xf32>
    %47 = arith.mulf %42, %46 : vector<8x1xf32>
    %cst_20 = arith.constant 7.812500e-03 : f32
    %48 = vector.broadcast %cst_20 : f32 to vector<8x1xf32>
    %49 = arith.mulf %45, %48 : vector<8x1xf32>
    %50 = arith.mulf %47, %47 : vector<8x1xf32>
    %51 = arith.subf %49, %50 : vector<8x1xf32>
    %cst_21 = arith.constant 0.000000e+00 : f32
    %52 = vector.broadcast %cst_21 : f32 to vector<8x1xf32>
    %53 = arith.maximumf %51, %52 : vector<8x1xf32>
    %54 = vector.broadcast %47 : vector<8x1xf32> to vector<8x128xf32>
    %55 = arith.subf %40, %54 : vector<8x128xf32>
    %cst_22 = arith.constant 9.99999974E-6 : f32
    %56 = vector.broadcast %cst_22 : f32 to vector<8x1xf32>
    %57 = arith.addf %53, %56 : vector<8x1xf32>
    %58 = math.rsqrt %57 : vector<8x1xf32>
    %59 = vector.broadcast %58 : vector<8x1xf32> to vector<8x128xf32>
    %60 = arith.mulf %55, %59 : vector<8x128xf32>
    %cst_23 = arith.constant 0.000000e+00 : f32
    %61 = vector.broadcast %cst_23 : f32 to vector<8x128xf32>
    %62 = arith.maximumf %60, %61 : vector<8x128xf32>
    %c2_i32 = arith.constant 2 : i32
    %63 = arith.index_cast %c2_i32 : i32 to index
    %c0_24 = arith.constant 0 : index
    %c0_25 = arith.constant 0 : index
    %64 = vector.load %arg1[%63, %c0_24, %c0_25] : memref<4x128x128xf32, #tpu.memory_space<vmem>>, vector<1x128x128xf32>
    %65 = vector.shape_cast %64 : vector<1x128x128xf32> to vector<128x128xf32>
    %66 = arith.index_cast %c2_i32 : i32 to index
    %c0_26 = arith.constant 0 : index
    %c0_27 = arith.constant 0 : index
    %67 = vector.load %arg2[%66, %c0_26, %c0_27] : memref<4x1x128xf32, #tpu.memory_space<vmem>>, vector<1x1x128xf32>
    %68 = vector.shape_cast %67 : vector<1x1x128xf32> to vector<1x128xf32>
    %cst_28 = arith.constant dense<0.000000e+00> : vector<8x128xf32>
    %69 = tpu.matmul %62, %65, %cst_28 {dimension_numbers = #tpu.dot_dimension_numbers<[1], [0], [0], [1], [0, 0, 1, 1], [], []>} : vector<8x128xf32>, vector<128x128xf32>, vector<8x128xf32> -> vector<8x128xf32>
    %70 = vector.broadcast %68 : vector<1x128xf32> to vector<8x128xf32>
    %71 = arith.addf %69, %70 : vector<8x128xf32>
    %cst_29 = arith.constant dense<0.000000e+00> : vector<8xf32>
    %72 = vector.multi_reduction <add>, %71, %cst_29 [1] : vector<8x128xf32> to vector<8xf32>
    %73 = vector.shape_cast %72 : vector<8xf32> to vector<8x1xf32>
    %74 = arith.mulf %71, %71 : vector<8x128xf32>
    %cst_30 = arith.constant dense<0.000000e+00> : vector<8xf32>
    %75 = vector.multi_reduction <add>, %74, %cst_30 [1] : vector<8x128xf32> to vector<8xf32>
    %76 = vector.shape_cast %75 : vector<8xf32> to vector<8x1xf32>
    %cst_31 = arith.constant 7.812500e-03 : f32
    %77 = vector.broadcast %cst_31 : f32 to vector<8x1xf32>
    %78 = arith.mulf %73, %77 : vector<8x1xf32>
    %cst_32 = arith.constant 7.812500e-03 : f32
    %79 = vector.broadcast %cst_32 : f32 to vector<8x1xf32>
    %80 = arith.mulf %76, %79 : vector<8x1xf32>
    %81 = arith.mulf %78, %78 : vector<8x1xf32>
    %82 = arith.subf %80, %81 : vector<8x1xf32>
    %cst_33 = arith.constant 0.000000e+00 : f32
    %83 = vector.broadcast %cst_33 : f32 to vector<8x1xf32>
    %84 = arith.maximumf %82, %83 : vector<8x1xf32>
    %85 = vector.broadcast %78 : vector<8x1xf32> to vector<8x128xf32>
    %86 = arith.subf %71, %85 : vector<8x128xf32>
    %cst_34 = arith.constant 9.99999974E-6 : f32
    %87 = vector.broadcast %cst_34 : f32 to vector<8x1xf32>
    %88 = arith.addf %84, %87 : vector<8x1xf32>
    %89 = math.rsqrt %88 : vector<8x1xf32>
    %90 = vector.broadcast %89 : vector<8x1xf32> to vector<8x128xf32>
    %91 = arith.mulf %86, %90 : vector<8x128xf32>
    %cst_35 = arith.constant 0.000000e+00 : f32
    %92 = vector.broadcast %cst_35 : f32 to vector<8x128xf32>
    %93 = arith.maximumf %91, %92 : vector<8x128xf32>
    %c3_i32 = arith.constant 3 : i32
    %94 = arith.index_cast %c3_i32 : i32 to index
    %c0_36 = arith.constant 0 : index
    %c0_37 = arith.constant 0 : index
    %95 = vector.load %arg1[%94, %c0_36, %c0_37] : memref<4x128x128xf32, #tpu.memory_space<vmem>>, vector<1x128x128xf32>
    %96 = vector.shape_cast %95 : vector<1x128x128xf32> to vector<128x128xf32>
    %97 = arith.index_cast %c3_i32 : i32 to index
    %c0_38 = arith.constant 0 : index
    %c0_39 = arith.constant 0 : index
    %98 = vector.load %arg2[%97, %c0_38, %c0_39] : memref<4x1x128xf32, #tpu.memory_space<vmem>>, vector<1x1x128xf32>
    %99 = vector.shape_cast %98 : vector<1x1x128xf32> to vector<1x128xf32>
    %cst_40 = arith.constant dense<0.000000e+00> : vector<8x128xf32>
    %100 = tpu.matmul %93, %96, %cst_40 {dimension_numbers = #tpu.dot_dimension_numbers<[1], [0], [0], [1], [0, 0, 1, 1], [], []>} : vector<8x128xf32>, vector<128x128xf32>, vector<8x128xf32> -> vector<8x128xf32>
    %101 = vector.broadcast %99 : vector<1x128xf32> to vector<8x128xf32>
    %102 = arith.addf %100, %101 : vector<8x128xf32>
    %cst_41 = arith.constant dense<0.000000e+00> : vector<8xf32>
    %103 = vector.multi_reduction <add>, %102, %cst_41 [1] : vector<8x128xf32> to vector<8xf32>
    %104 = vector.shape_cast %103 : vector<8xf32> to vector<8x1xf32>
    %105 = arith.mulf %102, %102 : vector<8x128xf32>
    %cst_42 = arith.constant dense<0.000000e+00> : vector<8xf32>
    %106 = vector.multi_reduction <add>, %105, %cst_42 [1] : vector<8x128xf32> to vector<8xf32>
    %107 = vector.shape_cast %106 : vector<8xf32> to vector<8x1xf32>
    %cst_43 = arith.constant 7.812500e-03 : f32
    %108 = vector.broadcast %cst_43 : f32 to vector<8x1xf32>
    %109 = arith.mulf %104, %108 : vector<8x1xf32>
    %cst_44 = arith.constant 7.812500e-03 : f32
    %110 = vector.broadcast %cst_44 : f32 to vector<8x1xf32>
    %111 = arith.mulf %107, %110 : vector<8x1xf32>
    %112 = arith.mulf %109, %109 : vector<8x1xf32>
    %113 = arith.subf %111, %112 : vector<8x1xf32>
    %cst_45 = arith.constant 0.000000e+00 : f32
    %114 = vector.broadcast %cst_45 : f32 to vector<8x1xf32>
    %115 = arith.maximumf %113, %114 : vector<8x1xf32>
    %116 = vector.broadcast %109 : vector<8x1xf32> to vector<8x128xf32>
    %117 = arith.subf %102, %116 : vector<8x128xf32>
    %cst_46 = arith.constant 9.99999974E-6 : f32
    %118 = vector.broadcast %cst_46 : f32 to vector<8x1xf32>
    %119 = arith.addf %115, %118 : vector<8x1xf32>
    %120 = math.rsqrt %119 : vector<8x1xf32>
    %121 = vector.broadcast %120 : vector<8x1xf32> to vector<8x128xf32>
    %122 = arith.mulf %117, %121 : vector<8x128xf32>
    %cst_47 = arith.constant 0.000000e+00 : f32
    %123 = vector.broadcast %cst_47 : f32 to vector<8x128xf32>
    %124 = arith.maximumf %122, %123 : vector<8x128xf32>
    %c4_i32 = arith.constant 4 : i32
    %c0_48 = arith.constant 0 : index
    %c0_49 = arith.constant 0 : index
    %125 = vector.load %arg3[%c0_48, %c0_49] : memref<8x128xf32, #tpu.memory_space<vmem>>, vector<8x128xf32>
    tpu.vector_store %arg3[%c0_48, %c0_49], %124 {strides = array<i32>} : memref<8x128xf32, #tpu.memory_space<vmem>>, vector<8x128xf32>,
    return
  }
}

</mosaic_0001>

<bundles_post_ra>
// kernel: tpu_custom_call.1
= control target key start
LH: loop header
LB: loop body
LE: loop exit
PB: predicated region body
PF: predicated region fallthrough
CT: control target
= control target key end

     0   :  { %8 = vsyncpa [#allocation3], 0  ;;  %s940_s0 = inlined_call_operand.hbm [shape: f32[8,128], index: 0, kind: input, shape index: {}]   ;;  %s941_s1 = inlined_call_operand.hbm [shape: f32[4,128,128], index: 1, kind: input, shape index: {}]   ;;  %s942_s2 = inlined_call_operand.hbm [shape: f32[4,1,128], index: 2, kind: input, shape index: {}]   ;;  %s943_s3 = inlined_call_operand.hbm [shape: f32[8,128], index: 3, kind: output, shape index: {}]  }
   0x1   :  { %9 = vsyncpa [#allocation6], 0 }
   0x2   :  { %10 = vsyncpa [#allocation4], 0  ;;  %s826_s12 = smov [#allocation5]  }
   0x3   :  { %s26_s13 = sshll.u32 %s826_s12, 4  ;;  %s27_s13 = int_to_ptr.vmem [resolvable:$true] %s26_s13 }
   0x4   :  { %s748_s14 = scalar_lea.vmem %s27_s13, 8192  ;;  %p753_p1 = scmp.lt.s32.totalorder %s27_s13, %s27_s13 }
   0x5   :  { %p749_p0 = scmp.ne.s32.totalorder %s27_s13, %s748_s14  ;;  %p754_p2 = scmp.lt.s32.totalorder %s748_s14, %s748_s14 }
   0x7   :  { %p755_p3 = por %p754_p2, %p753_p1 }
   0x9   :  { %p756_p4 = pnand %p755_p3, %p749_p0 }
   0xb   :  { %759 = shalt.err (!%p756_p4)
}
   0xc   :  { %s827_s15 = smov 128   ;;  %s828_s16 = smov 8  }
   0xd   :  { %32 = dma.hbm_to_vmem [thread:$0]  %s941_s1, 8192, %s27_s13, [#allocation6], %s827_s15, %s827_s15, %s828_s16  }
   0xe   :  { %s829_s19 = smov [#allocation2]   ;;  %s830_s21 = smov [#allocation7]  }
   0xf   :  { %s17_s20 = sshll.u32 %s829_s19, 4  ;;  %s38_s22 = sshll.u32 %s830_s21, 4  ;;  %s18_s20 = int_to_ptr.vmem [resolvable:$true] %s17_s20  ;;  %s39_s22 = int_to_ptr.vmem [resolvable:$true] %s38_s22 }
  0x10   :  { %s768_s23 = scalar_lea.vmem %s18_s20, 128  ;;  %p773_p6 = scmp.lt.s32.totalorder %s18_s20, %s18_s20 }
  0x11   :  { %p769_p5 = scmp.ne.s32.totalorder %s18_s20, %s768_s23  ;;  %p774_p7 = scmp.lt.s32.totalorder %s768_s23, %s768_s23 }
  0x13   :  { %p775_p8 = por %p774_p7, %p773_p6 }
  0x15   :  { %p776_p9 = pnand %p775_p8, %p769_p5 }
  0x17   :  { %779 = shalt.err (!%p776_p9)
}
  0x18   :  { %20 = dma.hbm_to_vmem [thread:$0]  %s940_s0, 128, %s18_s20, [#allocation3]  }
  0x19   :  { %s788_s26 = scalar_lea.vmem %s39_s22, 64  ;;  %p793_p11 = scmp.lt.s32.totalorder %s39_s22, %s39_s22 }
  0x1a   :  { %p789_p10 = scmp.ne.s32.totalorder %s39_s22, %s788_s26  ;;  %p794_p12 = scmp.lt.s32.totalorder %s788_s26, %s788_s26 }
  0x1c   :  { %p795_p13 = por %p794_p12, %p793_p11 }
  0x1e   :  { %p796_p0 = pnand %p795_p13, %p789_p10 }
  0x20   :  { %799 = shalt.err (!%p796_p0)
}
  0x21   :  { %s831_s1 = smov 16   ;;  %s832_s27 = smov 1  }
  0x22   :  { %44 = dma.hbm_to_vmem [thread:$0]  %s942_s2, 64, %s39_s22, [#allocation6], %s831_s1, %s831_s1, %s832_s27  }
  0x23   :  { %820 = dma.done.wait [#allocation3], 128  }
  0x24   :  { %821 = vsyncadd [#allocation3], 4294967168 }
  0x25   :  { %822 = dma.done.wait [#allocation6], 8256  }
  0x26   :  { %823 = vsyncadd [#allocation6], 4294959040  ;;  %v833_v0 = vmov 0.0   ;;  %vm834_vm0 = vmmov 0   ;;  %v70_v1 = vld [vmem:[#allocation5 + $0x78] sm:$0xff]  ;;  %v69_v2 = vld [vmem:[#allocation5 + $0x70] sm:$0xff] }
  0x27   :  { %582 = vmatprep.subr.mxu0 %v833_v0  ;;  %614 = vmatprep.mubr.msk.f32.mxu0 %vm834_vm0, %v833_v0  ;;  %v68_v3 = vld [vmem:[#allocation5 + $0x68] sm:$0xff]  ;;  %v67_v4 = vld [vmem:[#allocation5 + $0x60] sm:$0xff]  ;;  %v66_v5 = vld [vmem:[#allocation5 + $0x58] sm:$0xff]  ;;  %s835_s0 = smov [#allocation8]  }
  0x28   :  { %617 = vmatprep.subr.mxu1 %v833_v0  ;;  %649 = vmatprep.mubr.msk.f32.mxu1 %vm834_vm0, %v833_v0  ;;  %v65_v6 = vld [vmem:[#allocation5 + $0x50] sm:$0xff]  ;;  %v64_v7 = vld [vmem:[#allocation5 + $0x48] sm:$0xff]  ;;  %v63_v8 = vld [vmem:[#allocation5 + $0x40] sm:$0xff]  ;;  %s500_s2 = sshll.u32 %s835_s0, 4  ;;  %s501_s2 = int_to_ptr.vmem [resolvable:$true] %s500_s2 }
  0x29   :  { %583 = vmatpush3.msra.mxu0 %v70_v1  ;;  %v62_v9 = vld [vmem:[#allocation5 + $0x38] sm:$0xff]  ;;  %v61_v10 = vld [vmem:[#allocation5 + $0x30] sm:$0xff]  ;;  %v60_v11 = vld [vmem:[#allocation5 + $0x28] sm:$0xff]  ;;  %s800_s30 = scalar_lea.vmem %s501_s2, 128  ;;  %p805_p2 = scmp.lt.s32.totalorder %s501_s2, %s501_s2 }
  0x2a   :  { %584 = vmatprep.subr.mxu0 %v833_v0  ;;  %v59_v12 = vld [vmem:[#allocation5 + $0x20] sm:$0xff]  ;;  %v58_v13 = vld [vmem:[#allocation5 + $0x18] sm:$0xff]  ;;  %v57_v14 = vld [vmem:[#allocation5 + $0x10] sm:$0xff]  ;;  %p801_p1 = scmp.ne.s32.totalorder %s501_s2, %s800_s30  ;;  %p806_p3 = scmp.lt.s32.totalorder %s800_s30, %s800_s30 }
  0x2b   :  { %585 = vmatpush3.msra.mxu0 %v69_v2  ;;  %v56_v15 = vld [vmem:[#allocation5 + $0x8] sm:$0xff]  ;;  %v55_v16 = vld [vmem:[#allocation5] sm:$0xff]  ;;  %v54_v17 = vld [vmem:[#allocation2] sm:$0xff] }
  0x2c   :  { %586 = vmatprep.subr.mxu0 %v833_v0  ;;  %v179_v18 = vld [vmem:[#allocation5 + $0xf8] sm:$0xff]  ;;  %v510_v19 = vld [vmem:[#allocation7] ss:$0 sm:$0xff]  ;;  %v178_v24 = vld [vmem:[#allocation5 + $0xf0] sm:$0xff]  ;;  %p807_p4 = por %p806_p3, %p805_p2 }
  0x2d   :  { %587 = vmatpush3.msra.mxu0 %v68_v3  ;;  %618 = vmatpush3.msra.mxu1 %v179_v18  ;;  %v177_v25 = vld [vmem:[#allocation5 + $0xe8] sm:$0xff]  ;;  %v176_v26 = vld [vmem:[#allocation5 + $0xe0] sm:$0xff]  ;;  %v175_v27 = vld [vmem:[#allocation5 + $0xd8] sm:$0xff] }
  0x2e   :  { %588 = vmatprep.subr.mxu0 %v833_v0  ;;  %619 = vmatprep.subr.mxu1 %v833_v0  ;;  %v174_v28 = vld [vmem:[#allocation5 + $0xd0] sm:$0xff]  ;;  %v173_v29 = vld [vmem:[#allocation5 + $0xc8] sm:$0xff]  ;;  %v172_v30 = vld [vmem:[#allocation5 + $0xc0] sm:$0xff]  ;;  %p808_p5 = pnand %p807_p4, %p801_p1 }
  0x2f   :  { %589 = vmatpush3.msra.mxu0 %v67_v4  ;;  %620 = vmatpush3.msra.mxu1 %v178_v24  ;;  %v171_v31 = vld [vmem:[#allocation5 + $0xb8] sm:$0xff]  ;;  %v170_v32 = vld [vmem:[#allocation5 + $0xb0] sm:$0xff]  ;;  %v169_v33 = vld [vmem:[#allocation5 + $0xa8] sm:$0xff] }
  0x30   :  { %590 = vmatprep.subr.mxu0 %v833_v0  ;;  %621 = vmatprep.subr.mxu1 %v833_v0  ;;  %v168_v34 = vld [vmem:[#allocation5 + $0xa0] sm:$0xff]  ;;  %v167_v35 = vld [vmem:[#allocation5 + $0x98] sm:$0xff]  ;;  %v166_v36 = vld [vmem:[#allocation5 + $0x90] sm:$0xff] }
  0x31   :  { %591 = vmatpush3.msra.mxu0 %v66_v5  ;;  %622 = vmatpush3.msra.mxu1 %v177_v25  ;;  %v165_v37 = vld [vmem:[#allocation5 + $0x88] sm:$0xff]  ;;  %v164_v38 = vld [vmem:[#allocation5 + $0x80] sm:$0xff]  ;;  %v289_v51 = vld [vmem:[#allocation5 + $0x178] sm:$0xff] }
  0x32   :  { %592 = vmatprep.subr.mxu0 %v833_v0  ;;  %623 = vmatprep.subr.mxu1 %v833_v0  ;;  %v511_v52 = vld [vmem:[#allocation7 + $0x1] ss:$0 sm:$0xff]  ;;  %v288_v57 = vld [vmem:[#allocation5 + $0x170] sm:$0xff]  ;;  %v287_v58 = vld [vmem:[#allocation5 + $0x168] sm:$0xff] }
  0x33   :  { %593 = vmatpush3.msra.mxu0 %v65_v6  ;;  %624 = vmatpush3.msra.mxu1 %v176_v26  ;;  %v286_v59 = vld [vmem:[#allocation5 + $0x160] sm:$0xff]  ;;  %v285_v60 = vld [vmem:[#allocation5 + $0x158] sm:$0xff]  ;;  %v284_v61 = vld [vmem:[#allocation5 + $0x150] sm:$0xff] }
  0x34   :  { %594 = vmatprep.subr.mxu0 %v833_v0  ;;  %625 = vmatprep.subr.mxu1 %v833_v0  ;;  %v283_v62 = vld [vmem:[#allocation5 + $0x148] sm:$0xff]  ;;  %v282_v63 = vld [vmem:[#allocation5 + $0x140] sm:$0xff]  ;;  %v281_v1 = vld [vmem:[#allocation5 + $0x138] sm:$0xff] }
  0x35   :  { %595 = vmatpush3.msra.mxu0 %v64_v7  ;;  %626 = vmatpush3.msra.mxu1 %v175_v27  ;;  %v280_v2 = vld [vmem:[#allocation5 + $0x130] sm:$0xff]  ;;  %v279_v3 = vld [vmem:[#allocation5 + $0x128] sm:$0xff]  ;;  %v278_v4 = vld [vmem:[#allocation5 + $0x120] sm:$0xff] }
  0x36   :  { %596 = vmatprep.subr.mxu0 %v833_v0  ;;  %627 = vmatprep.subr.mxu1 %v833_v0  ;;  %v277_v5 = vld [vmem:[#allocation5 + $0x118] sm:$0xff]  ;;  %v276_v6 = vld [vmem:[#allocation5 + $0x110] sm:$0xff]  ;;  %v275_v7 = vld [vmem:[#allocation5 + $0x108] sm:$0xff] }
  0x37   :  { %597 = vmatpush3.msra.mxu0 %v63_v8  ;;  %628 = vmatpush3.msra.mxu1 %v174_v28  ;;  %v274_v8 = vld [vmem:[#allocation5 + $0x100] sm:$0xff]  ;;  %v397_v28 = vld [vmem:[#allocation5 + $0x1e8] sm:$0xff] }
  0x38   :  { %598 = vmatprep.subr.mxu0 %v833_v0  ;;  %629 = vmatprep.subr.mxu1 %v833_v0 }
  0x39   :  { %599 = vmatpush3.msra.mxu0 %v62_v9  ;;  %630 = vmatpush3.msra.mxu1 %v173_v29  ;;  %v396_v29 = vld [vmem:[#allocation5 + $0x1e0] sm:$0xff] }
  0x3a   :  { %600 = vmatprep.subr.mxu0 %v833_v0  ;;  %631 = vmatprep.subr.mxu1 %v833_v0 }
  0x3b   :  { %601 = vmatpush3.msra.mxu0 %v61_v10  ;;  %632 = vmatpush3.msra.mxu1 %v172_v30  ;;  %v395_v30 = vld [vmem:[#allocation5 + $0x1d8] sm:$0xff] }
  0x3c   :  { %602 = vmatprep.subr.mxu0 %v833_v0  ;;  %633 = vmatprep.subr.mxu1 %v833_v0 }
  0x3d   :  { %603 = vmatpush3.msra.mxu0 %v60_v11  ;;  %634 = vmatpush3.msra.mxu1 %v171_v31  ;;  %v394_v31 = vld [vmem:[#allocation5 + $0x1d0] sm:$0xff] }
  0x3e   :  { %604 = vmatprep.subr.mxu0 %v833_v0  ;;  %635 = vmatprep.subr.mxu1 %v833_v0 }
  0x3f   :  { %605 = vmatpush3.msra.mxu0 %v59_v12  ;;  %636 = vmatpush3.msra.mxu1 %v170_v32  ;;  %v393_v32 = vld [vmem:[#allocation5 + $0x1c8] sm:$0xff] }
  0x40   :  { %606 = vmatprep.subr.mxu0 %v833_v0  ;;  %637 = vmatprep.subr.mxu1 %v833_v0 }
  0x41   :  { %607 = vmatpush3.msra.mxu0 %v58_v13  ;;  %638 = vmatpush3.msra.mxu1 %v169_v33  ;;  %v392_v33 = vld [vmem:[#allocation5 + $0x1c0] sm:$0xff] }
  0x42   :  { %608 = vmatprep.subr.mxu0 %v833_v0  ;;  %639 = vmatprep.subr.mxu1 %v833_v0 }
  0x43   :  { %609 = vmatpush3.msra.mxu0 %v57_v14  ;;  %640 = vmatpush3.msra.mxu1 %v168_v34  ;;  %v391_v34 = vld [vmem:[#allocation5 + $0x1b8] sm:$0xff] }
  0x44   :  { %610 = vmatprep.subr.mxu0 %v833_v0  ;;  %641 = vmatprep.subr.mxu1 %v833_v0 }
  0x45   :  { %611 = vmatpush3.msra.mxu0 %v56_v15  ;;  %642 = vmatpush3.msra.mxu1 %v167_v35  ;;  %v390_v35 = vld [vmem:[#allocation5 + $0x1b0] sm:$0xff] }
  0x46   :  { %612 = vmatprep.subr.mxu0 %v833_v0  ;;  %643 = vmatprep.subr.mxu1 %v833_v0 }
  0x47   :  { %613 = vmatpush3.msra.mxu0 %v55_v16  ;;  %644 = vmatpush3.msra.mxu1 %v166_v36  ;;  %v389_v36 = vld [vmem:[#allocation5 + $0x1a8] sm:$0xff] }
  0x48   :  { %615 = vmatmul.mubr.f32.vlgmr.msra.gmra.mxu0 %v54_v17  ;;  %652 = vmatprep.subr.mxu0 %v833_v0 }
  0x49   :  { %684 = vmatprep.mubr.msk.f32.mxu0 %vm834_vm0, %v833_v0  ;;  %645 = vmatprep.subr.mxu1 %v833_v0 }
  0x4a   :  { %646 = vmatpush3.msra.mxu1 %v165_v37  ;;  %653 = vmatpush3.msra.mxu0 %v289_v51  ;;  %v388_v37 = vld [vmem:[#allocation5 + $0x1a0] sm:$0xff] }
  0x4b   :  { %647 = vmatprep.subr.mxu1 %v833_v0  ;;  %654 = vmatprep.subr.mxu0 %v833_v0 }
  0x4c   :  { %648 = vmatpush3.msra.mxu1 %v164_v38  ;;  %655 = vmatpush3.msra.mxu0 %v288_v57  ;;  %v387_v38 = vld [vmem:[#allocation5 + $0x198] sm:$0xff] }
  0x4d   :  { %687 = vmatprep.subr.mxu1 %v833_v0  ;;  %656 = vmatprep.subr.mxu0 %v833_v0 }
  0x4e   :  { %657 = vmatpush3.msra.mxu0 %v287_v58 }
  0x4f   :  { %658 = vmatprep.subr.mxu0 %v833_v0 }
  0x50   :  { %659 = vmatpush3.msra.mxu0 %v286_v59 }
  0x51   :  { %660 = vmatprep.subr.mxu0 %v833_v0 }
  0x52   :  { %661 = vmatpush3.msra.mxu0 %v285_v60 }
  0x53   :  { %662 = vmatprep.subr.mxu0 %v833_v0 }
  0x54   :  { %663 = vmatpush3.msra.mxu0 %v284_v61 }
  0x55   :  { %664 = vmatprep.subr.mxu0 %v833_v0 }
  0x56   :  { %665 = vmatpush3.msra.mxu0 %v283_v62 }
  0x57   :  { %666 = vmatprep.subr.mxu0 %v833_v0 }
  0x58   :  { %667 = vmatpush3.msra.mxu0 %v282_v63 }
  0x59   :  { %668 = vmatprep.subr.mxu0 %v833_v0 }
  0x5a   :  { %669 = vmatpush3.msra.mxu0 %v281_v1 }
  0x5b   :  { %670 = vmatprep.subr.mxu0 %v833_v0 }
  0x5c   :  { %671 = vmatpush3.msra.mxu0 %v280_v2 }
  0x5d   :  { %672 = vmatprep.subr.mxu0 %v833_v0 }
  0x5e   :  { %673 = vmatpush3.msra.mxu0 %v279_v3 }
  0x5f   :  { %674 = vmatprep.subr.mxu0 %v833_v0 }
  0x60   :  { %675 = vmatpush3.msra.mxu0 %v278_v4 }
  0x61   :  { %676 = vmatprep.subr.mxu0 %v833_v0 }
  0x62   :  { %677 = vmatpush3.msra.mxu0 %v277_v5 }
  0x63   :  { %678 = vmatprep.subr.mxu0 %v833_v0 }
  0x64   :  { %679 = vmatpush3.msra.mxu0 %v276_v6 }
  0x65   :  { %680 = vmatprep.subr.mxu0 %v833_v0 }
  0x66   :  { %681 = vmatpush3.msra.mxu0 %v275_v7 }
  0x67   :  { %682 = vmatprep.subr.mxu0 %v833_v0 }
  0x68   :  { %683 = vmatpush3.msra.mxu0 %v274_v8 }
 0x108   :  { %v144_v20 = vpop.f32.mrf.mxu0 }
 0x109   :  { %v145_v21 = vadd.f32 %v510_v19, %v144_v20 }
 0x10a   :  { %v616_v22 = vpop.f32.mrf.mxu0 }
 0x10b   :  { %148 = vadd.xlane.f32.xlu0 %v145_v21  ;;  %v150_v23 = vmul.f32 %v145_v21, %v145_v21  ;;  %v398_v22 = vld [vmem:[#allocation5 + $0x1f0] sm:$0xff] }
 0x10f   :  { %151 = vadd.xlane.f32.xlu0 %v150_v23  ;;  %v512_v23 = vld [vmem:[#allocation7 + $0x2] ss:$0 sm:$0xff] }
 0x194   :  { %v149_v39 = vpop.xlane.xlu0 %148 }
 0x195   :  { %v153_v40 = vmul.f32 0.0078125, %v149_v39  ;;  %v386_v39 = vld [vmem:[#allocation5 + $0x190] sm:$0xff] }
 0x197   :  { %v155_v42 = vmul.f32 %v153_v40, %v153_v40  ;;  %v158_v47 = vsub.f32 %v145_v21, %v153_v40  ;;  %v399_v21 = vld [vmem:[#allocation5 + $0x1f8] sm:$0xff]  ;;  %v385_v40 = vld [vmem:[#allocation5 + $0x188] sm:$0xff] }
 0x198   :  { %v152_v41 = vpop.xlane.xlu0 %151 }
 0x199   :  { %v154_v43 = vmul.f32 0.0078125, %v152_v41  ;;  %v384_v41 = vld [vmem:[#allocation5 + $0x180] sm:$0xff] }
 0x19b   :  { %v156_v44 = vsub.f32 %v154_v43, %v155_v42 }
 0x19d   :  { %v157_v45 = vmax.f32 %v156_v44, 0.0 }
 0x19f   :  { %v159_v46 = vadd.f32 1e-05, %v157_v45 }
 0x1a1   :  { %732 = vrsqrt.f32 %v159_v46 }
 0x1ae   :  { %v733_v48 = vpop.eup %732 }
 0x1af   :  { %v161_v49 = vmul.f32 %v733_v48, %v158_v47 }
 0x1b1   :  { %v162_v50 = vmax.f32 %v161_v49, 0.0 }
 0x1b3   :  { %650 = vmatmul.mubr.f32.vlgmr.msra.gmra.mxu1 %v162_v50 }
 0x1b4   :  { %719 = vmatprep.mubr.msk.f32.mxu1 %vm834_vm0, %v833_v0  ;;  %688 = vmatpush3.msra.mxu1 %v399_v21 }
 0x1b5   :  { %689 = vmatprep.subr.mxu1 %v833_v0 }
 0x1b6   :  { %690 = vmatpush3.msra.mxu1 %v398_v22 }
 0x1b7   :  { %691 = vmatprep.subr.mxu1 %v833_v0 }
 0x1b8   :  { %692 = vmatpush3.msra.mxu1 %v397_v28 }
 0x1b9   :  { %693 = vmatprep.subr.mxu1 %v833_v0 }
 0x1ba   :  { %694 = vmatpush3.msra.mxu1 %v396_v29 }
 0x1bb   :  { %695 = vmatprep.subr.mxu1 %v833_v0 }
 0x1bc   :  { %696 = vmatpush3.msra.mxu1 %v395_v30 }
 0x1bd   :  { %697 = vmatprep.subr.mxu1 %v833_v0 }
 0x1be   :  { %698 = vmatpush3.msra.mxu1 %v394_v31 }
 0x1bf   :  { %699 = vmatprep.subr.mxu1 %v833_v0 }
 0x1c0   :  { %700 = vmatpush3.msra.mxu1 %v393_v32 }
 0x1c1   :  { %701 = vmatprep.subr.mxu1 %v833_v0 }
 0x1c2   :  { %702 = vmatpush3.msra.mxu1 %v392_v33 }
 0x1c3   :  { %703 = vmatprep.subr.mxu1 %v833_v0 }
 0x1c4   :  { %704 = vmatpush3.msra.mxu1 %v391_v34 }
 0x1c5   :  { %705 = vmatprep.subr.mxu1 %v833_v0 }
 0x1c6   :  { %706 = vmatpush3.msra.mxu1 %v390_v35 }
 0x1c7   :  { %707 = vmatprep.subr.mxu1 %v833_v0 }
 0x1c8   :  { %708 = vmatpush3.msra.mxu1 %v389_v36 }
 0x1c9   :  { %709 = vmatprep.subr.mxu1 %v833_v0 }
 0x1ca   :  { %710 = vmatpush3.msra.mxu1 %v388_v37 }
 0x1cb   :  { %711 = vmatprep.subr.mxu1 %v833_v0 }
 0x1cc   :  { %712 = vmatpush3.msra.mxu1 %v387_v38 }
 0x1cd   :  { %713 = vmatprep.subr.mxu1 %v833_v0 }
 0x1ce   :  { %714 = vmatpush3.msra.mxu1 %v386_v39 }
 0x1cf   :  { %715 = vmatprep.subr.mxu1 %v833_v0 }
 0x1d0   :  { %716 = vmatpush3.msra.mxu1 %v385_v40 }
 0x1d1   :  { %717 = vmatprep.subr.mxu1 %v833_v0 }
 0x1d2   :  { %718 = vmatpush3.msra.mxu1 %v384_v41 }
 0x273   :  { %v254_v53 = vpop.f32.mrf.mxu1 }
 0x274   :  { %v255_v54 = vadd.f32 %v511_v52, %v254_v53 }
 0x275   :  { %v651_v55 = vpop.f32.mrf.mxu1 }
 0x276   :  { %258 = vadd.xlane.f32.xlu1 %v255_v54  ;;  %v260_v56 = vmul.f32 %v255_v54, %v255_v54 }
 0x27a   :  { %261 = vadd.xlane.f32.xlu1 %v260_v56 }
 0x2ff   :  { %v259_v9 = vpop.xlane.xlu1 %258 }
 0x300   :  { %v263_v10 = vmul.f32 0.0078125, %v259_v9 }
 0x302   :  { %v265_v12 = vmul.f32 %v263_v10, %v263_v10  ;;  %v268_v17 = vsub.f32 %v255_v54, %v263_v10  ;;  %v513_v54 = vld [vmem:[#allocation7 + $0x3] ss:$0 sm:$0xff] }
 0x303   :  { %v262_v11 = vpop.xlane.xlu1 %261 }
 0x304   :  { %v264_v13 = vmul.f32 0.0078125, %v262_v11 }
 0x306   :  { %v266_v14 = vsub.f32 %v264_v13, %v265_v12 }
 0x308   :  { %v267_v15 = vmax.f32 %v266_v14, 0.0 }
 0x30a   :  { %v269_v16 = vadd.f32 1e-05, %v267_v15 }
 0x30c   :  { %734 = vrsqrt.f32 %v269_v16 }
 0x319   :  { %v735_v18 = vpop.eup %734 }
 0x31a   :  { %v271_v19 = vmul.f32 %v735_v18, %v268_v17 }
 0x31c   :  { %v272_v20 = vmax.f32 %v271_v19, 0.0 }
 0x31e   :  { %685 = vmatmul.mubr.f32.vlgmr.msra.gmra.mxu0 %v272_v20 }
 0x3de   :  { %v364_v24 = vpop.f32.mrf.mxu0 }
 0x3df   :  { %v365_v25 = vadd.f32 %v512_v23, %v364_v24 }
 0x3e0   :  { %v686_v26 = vpop.f32.mrf.mxu0 }
 0x3e1   :  { %368 = vadd.xlane.f32.xlu0 %v365_v25  ;;  %v370_v27 = vmul.f32 %v365_v25, %v365_v25 }
 0x3e3   :  { %371 = vadd.xlane.f32.xlu1 %v370_v27 }
 0x46a   :  { %v369_v42 = vpop.xlane.xlu0 %368 }
 0x46b   :  { %v373_v43 = vmul.f32 0.0078125, %v369_v42 }
 0x46c   :  { %v372_v44 = vpop.xlane.xlu1 %371 }
 0x46d   :  { %v375_v45 = vmul.f32 %v373_v43, %v373_v43  ;;  %v374_v46 = vmul.f32 0.0078125, %v372_v44  ;;  %v378_v50 = vsub.f32 %v365_v25, %v373_v43 }
 0x46f   :  { %v376_v47 = vsub.f32 %v374_v46, %v375_v45 }
 0x471   :  { %v377_v48 = vmax.f32 %v376_v47, 0.0 }
 0x473   :  { %v379_v49 = vadd.f32 1e-05, %v377_v48 }
 0x475   :  { %736 = vrsqrt.f32 %v379_v49 }
 0x482   :  { %v737_v51 = vpop.eup %736 }
 0x483   :  { %v381_v52 = vmul.f32 %v737_v51, %v378_v50 }
 0x485   :  { %v382_v53 = vmax.f32 %v381_v52, 0.0 }
 0x487   :  { %720 = vmatmul.mubr.f32.vlgmr.msra.gmra.mxu1 %v382_v53 }
 0x547   :  { %v474_v55 = vpop.f32.mrf.mxu1 }
 0x548   :  { %v475_v56 = vadd.f32 %v513_v54, %v474_v55 }
 0x549   :  { %v721_v57 = vpop.f32.mrf.mxu1 }
 0x54a   :  { %478 = vadd.xlane.f32.xlu0 %v475_v56  ;;  %v480_v0 = vmul.f32 %v475_v56, %v475_v56 }
 0x54c   :  { %481 = vadd.xlane.f32.xlu1 %v480_v0 }
 0x5d3   :  { %v479_v58 = vpop.xlane.xlu0 %478 }
 0x5d4   :  { %v483_v59 = vmul.f32 0.0078125, %v479_v58 }
 0x5d5   :  { %v482_v60 = vpop.xlane.xlu1 %481 }
 0x5d6   :  { %v485_v61 = vmul.f32 %v483_v59, %v483_v59  ;;  %v484_v62 = vmul.f32 0.0078125, %v482_v60  ;;  %v488_v3 = vsub.f32 %v475_v56, %v483_v59 }
 0x5d8   :  { %v486_v63 = vsub.f32 %v484_v62, %v485_v61 }
 0x5da   :  { %v487_v1 = vmax.f32 %v486_v63, 0.0 }
 0x5dc   :  { %v489_v2 = vadd.f32 1e-05, %v487_v1 }
 0x5de   :  { %738 = vrsqrt.f32 %v489_v2 }
 0x5eb   :  { %v739_v4 = vpop.eup %738 }
 0x5ec   :  { %v491_v5 = vmul.f32 %v739_v4, %v488_v3 }
 0x5ee   :  { %v492_v6 = vmax.f32 %v491_v5, 0.0 }
 0x5f0   :  { %493 = vst [vmem:[#allocation8] sm:$0xff] %v492_v6 }
 0x5f1   :  { %811 = shalt.err (!%p808_p5)
}
 0x5f2   :  { %503 = dma.vmem_to_hbm [thread:$0]  %s501_s2, 128, %s943_s3, [#allocation4]  }
 0x5f3   :  { %824 = dma.done.wait [#allocation4], 128  }
 0x5f4   :  { %825 = vsyncadd [#allocation4], 4294967168 }
 0x5f5   :  { %507 = vsyncpa [#allocation3], 1 }
 0x5f6   :  { %508 = vsyncpa [#allocation6], 1 }
 0x5f7   :  { %509 = vsyncpa [#allocation4], 1 }

</bundles_post_ra>
